<compile_context>
chip_gen: v6e
topology: v6e:2x2x1
jax: 0.10.0
libtpu: 0.0.40
codegen_flags: <defaults>
</compile_context>

<pallas_src>
import math

import jax
import jax.numpy as jnp
from jax.experimental import pallas as pl
from jax.experimental.pallas import tpu as pltpu


# Matmul tile defaults (shrunk to fit for small shapes).
_TM_DEFAULT = 512
_TN_DEFAULT = 1024
_TK_DEFAULT = 1024
# Quantize pre-pass block target (streaming kernels run at ~roofline at 512).
_QBLOCK_TARGET = 512


def _round_up(x, m):
    return ((x + m - 1) // m) * m


def _pick_qblock(dim, tile, target=_QBLOCK_TARGET):
    """Block size for the streaming quantize passes: prefer `target`, fall back
    to the matmul tile (which divides the padded dim by construction)."""
    b = min(target, dim)
    return b if dim % b == 0 else tile


# ---------------------------------------------------------------------------
# Quantization core: raw q values (scaled, clamped, 3-bit-mantissa rounded;
# NOT divided back by scale).  Pure VALU: no log2/exp2/divide.
# ---------------------------------------------------------------------------
def _fp8_quantize(x_f32, scale):
    s = x_f32 * scale
    s = jnp.clip(s, -448.0, 448.0)
    a = jnp.abs(s) + 1e-10                      # matches the reference epsilon

    # exponent = floor(log2(a)) via the f32 exponent field (a >= 1e-10 and
    # normal -> biased exponent in [93, 135]).
    bits = pltpu.bitcast(a, jnp.int32)
    exp_field = (bits >> 23) & 0xFF             # biased exponent
    # mantissa_step = 2^(exponent - 3) and its exact reciprocal 2^(3 - exponent)
    step = pltpu.bitcast((exp_field - 3) << 23, jnp.float32)
    inv_step = pltpu.bitcast((257 - exp_field) << 23, jnp.float32)

    return jnp.round(s * inv_step) * step       # round-half-even == torch.round


def _quantize_x_kernel(scale_ref, x_ref, q_ref):
    q = _fp8_quantize(x_ref[...].astype(jnp.float32), scale_ref[0])
    # q has <= 5 significand bits and |q| <= 448 -> exactly representable in bf16.
    q_ref[...] = q.astype(jnp.bfloat16)


def _quantize_wt_kernel(scale_ref, w_ref, q_ref):
    # w_ref block: (bn, bk) in the weight's native (N, K) layout.
    q = _fp8_quantize(w_ref[...].astype(jnp.float32), scale_ref[0])
    # Transpose on the XLU (idle in this VPU-bound kernel) -> MXU-native (K, N).
    q_ref[...] = q.T.astype(jnp.bfloat16)


def _quantize_x(x_p, scale_arr, br, bc):
    """x_p: (Mp, Kp), Mp % br == 0, Kp % bc == 0.  Returns bf16 raw q values."""
    R, C = x_p.shape
    return pl.pallas_call(
        _quantize_x_kernel,
        out_shape=jax.ShapeDtypeStruct((R, C), jnp.bfloat16),
        grid_spec=pltpu.PrefetchScalarGridSpec(
            num_scalar_prefetch=1,
            grid=(R // br, C // bc),
            in_specs=[pl.BlockSpec((br, bc), lambda i, j, s: (i, j))],
            out_specs=pl.BlockSpec((br, bc), lambda i, j, s: (i, j)),
        ),
        compiler_params=pltpu.CompilerParams(
            dimension_semantics=("parallel", "parallel")),
    )(scale_arr, x_p)


def _quantize_transpose_w(w_p, scale_arr, bn, bk):
    """weight (Np, Kp) -> bf16 raw-q wq_t (Kp, Np); pad/quantize/transpose fused
    into one streaming pass.  Pure function of (weight, scale): cacheable."""
    Np, Kp = w_p.shape
    return pl.pallas_call(
        _quantize_wt_kernel,
        out_shape=jax.ShapeDtypeStruct((Kp, Np), jnp.bfloat16),
        grid_spec=pltpu.PrefetchScalarGridSpec(
            num_scalar_prefetch=1,
            grid=(Kp // bk, Np // bn),
            in_specs=[pl.BlockSpec((bn, bk), lambda i, j, s: (j, i))],
            out_specs=pl.BlockSpec((bk, bn), lambda i, j, s: (i, j)),
        ),
        compiler_params=pltpu.CompilerParams(
            dimension_semantics=("parallel", "parallel")),
    )(scale_arr, w_p)


# ---------------------------------------------------------------------------
# Tiled bf16 matmul accumulating directly into the resident f32 output block,
# descale (single precomputed scalar) + bias only in the k == last finalize.
# ---------------------------------------------------------------------------
def _fp8_matmul_kernel(inv_ref, xq_ref, wq_ref, b_ref, o_ref):
    k = pl.program_id(2)

    @pl.when(k == 0)
    def _():
        o_ref[...] = jnp.zeros_like(o_ref)

    # bf16 x bf16 on the MXU, f32 accumulation.  Products are exact because the
    # q values carry <= 5 significand bits each.
    o_ref[...] += jnp.dot(xq_ref[...], wq_ref[...],
                          preferred_element_type=jnp.float32)

    @pl.when(k == pl.num_programs(2) - 1)
    def _():
        o_ref[...] = o_ref[...] * inv_ref[0] + b_ref[...].astype(jnp.float32)


def _fp8_matmul(xq, wq_t, bias2d, inv_arr, tm, tn, tk):
    Mp, Kp = xq.shape
    _, Np = wq_t.shape
    return pl.pallas_call(
        _fp8_matmul_kernel,
        out_shape=jax.ShapeDtypeStruct((Mp, Np), jnp.float32),
        grid_spec=pltpu.PrefetchScalarGridSpec(
            num_scalar_prefetch=1,
            grid=(Mp // tm, Np // tn, Kp // tk),
            in_specs=[
                pl.BlockSpec((tm, tk), lambda i, j, k, s: (i, k)),   # activations
                pl.BlockSpec((tk, tn), lambda i, j, k, s: (k, j)),   # weight (K, N)
                pl.BlockSpec((1, tn), lambda i, j, k, s: (0, j)),    # bias
            ],
            out_specs=pl.BlockSpec((tm, tn), lambda i, j, k, s: (i, j)),
        ),
        compiler_params=pltpu.CompilerParams(
            dimension_semantics=("parallel", "parallel", "arbitrary")),
    )(inv_arr, xq, wq_t, bias2d)


# ---------------------------------------------------------------------------
# Public wrapper: FP8Linear.forward (eval mode)
# ---------------------------------------------------------------------------
def fp8_linear_forward(x, weight, bias, input_scale, weight_scale,
                       tm=_TM_DEFAULT, tn=_TN_DEFAULT, tk=_TK_DEFAULT):
    """x: (B, K), weight: (N, K) [nn.Linear layout], bias: (N,), scales: scalars."""
    B, K = x.shape
    N, K2 = weight.shape
    assert K == K2

    # Shrink tiles for small shapes; keep bf16-packed (16, 128) alignment.
    # (For small-batch inference on v7x, prefer keeping Np/tn >= 2 so the
    #  megacore split has work on both TensorCores.)
    tm = min(tm, _round_up(B, 16))
    tk = min(tk, _round_up(K, 128))
    tn = min(tn, _round_up(N, 128))
    Mp, Kp, Np = _round_up(B, tm), _round_up(K, tk), _round_up(N, tn)

    # Zero-pad ONLY when the shape is not already tile-aligned
    # (quantize(0) == 0 -> padded K contributes nothing to the matmul).
    x_p = x if (Mp, Kp) == (B, K) else jnp.pad(x, ((0, Mp - B), (0, Kp - K)))
    w_p = weight if (Np, Kp) == (N, K) else jnp.pad(weight,
                                                    ((0, Np - N), (0, Kp - K)))
    b_p = bias if Np == N else jnp.pad(bias, (0, Np - N))
    b_p = b_p.reshape(1, Np).astype(jnp.float32)

    s_in = jnp.asarray([input_scale], dtype=jnp.float32)
    s_w = jnp.asarray([weight_scale], dtype=jnp.float32)
    # out = (q_x @ q_w.T) / (s_in^2 * s_w^2) + bias: fold both divides into one
    # scalar multiply, computed once here instead of per output tile.
    inv = 1.0 / (jnp.float32(input_scale) ** 2 * jnp.float32(weight_scale) ** 2)
    inv_arr = jnp.reshape(inv, (1,))

    # Streaming quantize pre-passes with their own large, lane-dense blocks.
    bm_q = _pick_qblock(Mp, tm)
    bk_q = _pick_qblock(Kp, tk)
    bn_q = _pick_qblock(Np, tn)

    xq = _quantize_x(x_p, s_in, bm_q, bk_q)               # (Mp, Kp) bf16 raw q
    wq_t = _quantize_transpose_w(w_p, s_w, bn_q, bk_q)    # (Kp, Np) bf16 raw q
    # NOTE: wq_t depends only on (weight, weight_scale) -> cache across eval
    # forwards to eliminate the weight pre-pass entirely.

    out_p = _fp8_matmul(xq, wq_t, b_p, inv_arr, tm, tn, tk)
    return out_p[:B, :N]


# ---------------------------------------------------------------------------
# Plain-JAX reference mirroring the PyTorch forward (for sanity check).
# ---------------------------------------------------------------------------
def _reference_quantize(t, scale):
    s = t * scale
    s = jnp.clip(s, -448.0, 448.0)
    a = jnp.abs(s)
    exponent = jnp.floor(jnp.log2(a + 1e-10))
    step = jnp.exp2(exponent - 3.0)
    q = jnp.round(s / step) * step
    return q / scale


def _reference_forward(x, weight, bias, s_in, s_w):
    xq = _reference_quantize(x, s_in)
    wq = _reference_quantize(weight, s_w)
    out = jnp.dot(xq, wq.T, precision=jax.lax.Precision.HIGHEST,
                  preferred_element_type=jnp.float32)
    out = out / (s_in * s_w)
    return out + bias[None, :]


if __name__ == "__main__":
    # Small shapes consistent with Linear forward: [batch, in_features].
    batch, in_features, out_features = 8, 32, 16

    key = jax.random.PRNGKey(0)
    kx, kw, kb = jax.random.split(key, 3)

    # Deterministic init matching __init__ (kaiming_uniform_(a=sqrt(5)) ->
    # U(-1/sqrt(fan_in), 1/sqrt(fan_in)) for both weight and bias bounds).
    fan_in = in_features
    w_bound = 1.0 / math.sqrt(fan_in)
    weight = jax.random.uniform(kw, (out_features, in_features),
                                minval=-w_bound, maxval=w_bound, dtype=jnp.float32)
    bias = jax.random.uniform(kb, (out_features,),
                              minval=-w_bound, maxval=w_bound, dtype=jnp.float32)
    x = jax.random.uniform(kx, (batch, in_features),
                           minval=-2.0, maxval=2.0, dtype=jnp.float32)

    # FP8ScalingFactor buffers initialize to 1.0 and are unchanged in eval mode.
    input_scale = 1.0
    weight_scale = 1.0

    out = fp8_linear_forward(x, weight, bias, input_scale, weight_scale)
    out = jax.block_until_ready(out)

    ref = _reference_forward(x, weight, bias,
                             jnp.float32(input_scale), jnp.float32(weight_scale))
    assert out.shape == (batch, out_features)
    assert jnp.allclose(out, ref, atol=1e-4, rtol=1e-4), "mismatch vs JAX reference"

    print("KERNEL_OK")
</pallas_src>

<mosaic_0001>
module attributes {stable_mosaic.version = 11 : i64} {
  func.func @_quantize_x_kernel(%arg0: i32, %arg1: i32, %arg2: memref<1xf32, #tpu.memory_space<smem>>, %arg3: memref<16x128xf32, #tpu.memory_space<vmem>>, %arg4: memref<16x128xbf16, #tpu.memory_space<vmem>>) attributes {dimension_semantics = [#tpu.dimension_semantics<parallel>, #tpu.dimension_semantics<parallel>], iteration_bounds = array<i64: 1, 1>, scalar_prefetch = 1 : i64, scratch_operands = 0 : i64, tpu.core_type = #tpu.core_type<tc>, window_params = [{transform_indices = @transform_0, window_bounds = array<i64: 16, 128>}, {transform_indices = @transform_1, window_bounds = array<i64: 16, 128>}]} {
    %c0 = arith.constant 0 : index
    %c0_0 = arith.constant 0 : index
    %0 = vector.load %arg3[%c0, %c0_0] : memref<16x128xf32, #tpu.memory_space<vmem>>, vector<16x128xf32>
    %c0_1 = arith.constant 0 : index
    %1 = memref.load %arg2[%c0_1] : memref<1xf32, #tpu.memory_space<smem>>
    %2 = vector.broadcast %1 : f32 to vector<16x128xf32>
    %3 = arith.mulf %0, %2 : vector<16x128xf32>
    %cst = arith.constant -4.480000e+02 : f32
    %cst_2 = arith.constant 4.480000e+02 : f32
    %4 = vector.broadcast %cst : f32 to vector<16x128xf32>
    %5 = arith.maximumf %4, %3 : vector<16x128xf32>
    %6 = vector.broadcast %cst_2 : f32 to vector<16x128xf32>
    %7 = arith.minimumf %6, %5 : vector<16x128xf32>
    %8 = math.absf %7 : vector<16x128xf32>
    %cst_3 = arith.constant 1.000000e-10 : f32
    %9 = vector.broadcast %cst_3 : f32 to vector<16x128xf32>
    %10 = arith.addf %8, %9 : vector<16x128xf32>
    %11 = tpu.bitcast %10 : vector<16x128xf32> -> vector<16x128xi32>
    %c23_i32 = arith.constant 23 : i32
    %12 = vector.broadcast %c23_i32 : i32 to vector<16x128xi32>
    %13 = arith.shrsi %11, %12 : vector<16x128xi32>
    %c255_i32 = arith.constant 255 : i32
    %14 = vector.broadcast %c255_i32 : i32 to vector<16x128xi32>
    %15 = arith.andi %13, %14 : vector<16x128xi32>
    %c3_i32 = arith.constant 3 : i32
    %16 = vector.broadcast %c3_i32 : i32 to vector<16x128xi32>
    %17 = arith.subi %15, %16 : vector<16x128xi32>
    %c23_i32_4 = arith.constant 23 : i32
    %18 = vector.broadcast %c23_i32_4 : i32 to vector<16x128xi32>
    %19 = arith.shli %17, %18 : vector<16x128xi32>
    %20 = tpu.bitcast %19 : vector<16x128xi32> -> vector<16x128xf32>
    %c257_i32 = arith.constant 257 : i32
    %21 = vector.broadcast %c257_i32 : i32 to vector<16x128xi32>
    %22 = arith.subi %21, %15 : vector<16x128xi32>
    %c23_i32_5 = arith.constant 23 : i32
    %23 = vector.broadcast %c23_i32_5 : i32 to vector<16x128xi32>
    %24 = arith.shli %22, %23 : vector<16x128xi32>
    %25 = tpu.bitcast %24 : vector<16x128xi32> -> vector<16x128xf32>
    %26 = arith.mulf %7, %25 : vector<16x128xf32>
    %27 = math.roundeven %26 : vector<16x128xf32>
    %28 = arith.mulf %27, %20 : vector<16x128xf32>
    %29 = arith.truncf %28 : vector<16x128xf32> to vector<16x128xbf16>
    %c0_6 = arith.constant 0 : index
    %c0_7 = arith.constant 0 : index
    %30 = vector.load %arg4[%c0_6, %c0_7] : memref<16x128xbf16, #tpu.memory_space<vmem>>, vector<16x128xbf16>
    tpu.vector_store %arg4[%c0_6, %c0_7], %29 {strides = array<i32>} : memref<16x128xbf16, #tpu.memory_space<vmem>>, vector<16x128xbf16>,
    return
  }
  func.func @transform_0(%arg0: i32, %arg1: i32, %arg2: memref<1xf32, #tpu.memory_space<smem>>) -> (i32, i32) {
    %c0_i32 = arith.constant 0 : i32
    return %arg0, %arg1 : i32, i32
  }
  func.func @transform_1(%arg0: i32, %arg1: i32, %arg2: memref<1xf32, #tpu.memory_space<smem>>) -> (i32, i32) {
    %c0_i32 = arith.constant 0 : i32
    return %arg0, %arg1 : i32, i32
  }
}

</mosaic_0001>

<bundles_post_ra>
// kernel: tpu_custom_call.1
= control target key start
LH: loop header
LB: loop body
LE: loop exit
PB: predicated region body
PF: predicated region fallthrough
CT: control target
= control target key end

     0   :  { %8 = vsyncpa [#allocation5], 0  ;;  %s199_s0 = inlined_call_operand.<no memory space> [shape: f32[1], index: 0, kind: input, shape index: {}]   ;;  %s200_s1 = inlined_call_operand.hbm [shape: f32[16,128], index: 1, kind: input, shape index: {}]   ;;  %s201_s2 = inlined_call_operand.hbm [shape: bf16[16,128], index: 2, kind: output, shape index: {}]  }
   0x1   :  { %9 = vsyncpa [#allocation6], 0  ;;  %s169_s9 = smov [#allocation4]  }
   0x2   :  { %s15_s10 = sshll.u32 %s169_s9, 4  ;;  %s16_s10 = int_to_ptr.vmem [resolvable:$true] %s15_s10 }
   0x3   :  { %s133_s11 = scalar_lea.vmem %s16_s10, 256  ;;  %p138_p1 = scmp.lt.s32.totalorder %s16_s10, %s16_s10 }
   0x4   :  { %p134_p0 = scmp.ne.s32.totalorder %s16_s10, %s133_s11  ;;  %p139_p2 = scmp.lt.s32.totalorder %s133_s11, %s133_s11 }
   0x6   :  { %p140_p3 = por %p139_p2, %p138_p1 }
   0x8   :  { %p141_p4 = pnand %p140_p3, %p134_p0 }
   0xa   :  { %144 = shalt.err (!%p141_p4)
}
   0xb   :  { %s170_s12 = smov 128   ;;  %s171_s13 = smov 8  }
   0xc   :  { %21 = dma.hbm_to_vmem [thread:$0]  %s200_s1, 256, %s16_s10, [#allocation5], %s170_s12, %s170_s12, %s171_s13  }
   0xd   :  { %165 = dma.done.wait [#allocation5], 256  }
   0xe   :  { %166 = vsyncadd [#allocation5], 4294967040  ;;  %v28_v0 = vstv %s199_s0  ;;  %v25_v1 = vld [vmem:[#allocation4] sm:$0xff]  ;;  %v26_v2 = vld [vmem:[#allocation4 + $0x8] sm:$0xff]  ;;  %s172_s0 = smov [#allocation7]  }
   0xf   :  { %v29_v3 = vmul.f32 %v28_v0, %v25_v1  ;;  %v30_v4 = vmul.f32 %v28_v0, %v26_v2  ;;  %s78_s1 = sshll.u32 %s172_s0, 4  ;;  %s79_s1 = int_to_ptr.vmem [resolvable:$true] %s78_s1 }
  0x10   :  { %s145_s18 = scalar_lea.vmem %s79_s1, 128  ;;  %p150_p6 = scmp.lt.s32.totalorder %s79_s1, %s79_s1 }
  0x11   :  { %v90_v5 = vclamps-f32 %v29_v3, 448.0  ;;  %v91_v6 = vclamps-f32 %v30_v4, 448.0  ;;  %p146_p5 = scmp.ne.s32.totalorder %s79_s1, %s145_s18  ;;  %p151_p7 = scmp.lt.s32.totalorder %s145_s18, %s145_s18 }
  0x13   :  { %v35_v7 = vand.u32 2147483647, %v90_v5  ;;  %v36_v8 = vand.u32 2147483647, %v91_v6  ;;  %p152_p8 = por %p151_p7, %p150_p6 }
  0x15   :  { %v37_v9 = vadd.f32 1e-10, %v35_v7  ;;  %v38_v10 = vadd.f32 1e-10, %v36_v8  ;;  %p153_p9 = pnand %p152_p8, %p146_p5 }
  0x17   :  { %v41_v11 = vshra.s32 %v37_v9, 23  ;;  %v42_v12 = vshra.s32 %v38_v10, 23 }
  0x19   :  { %v43_v13 = vand.u32 255, %v41_v11  ;;  %v44_v14 = vand.u32 255, %v42_v12 }
  0x1b   :  { %v51_v15 = vsub.s32 257, %v43_v13  ;;  %v52_v16 = vsub.s32 257, %v44_v14  ;;  %v92_v22 = vadd.s32 4294967293, %v43_v13  ;;  %v93_v25 = vadd.s32 4294967293, %v44_v14 }
  0x1d   :  { %v53_v17 = vshll.u32 %v51_v15, 23  ;;  %v54_v18 = vshll.u32 %v52_v16, 23  ;;  %v47_v32 = vshll.u32 %v92_v22, 23  ;;  %v48_v34 = vshll.u32 %v93_v25, 23 }
  0x1f   :  { %v57_v19 = vmul.f32 %v90_v5, %v53_v17  ;;  %v58_v20 = vmul.f32 %v91_v6, %v54_v18 }
  0x21   :  { %v105_v21 = vcvt.f32.s32 %v57_v19  ;;  %v103_v23 = vand.u32 2147483647, %v57_v19  ;;  %v113_v24 = vcvt.f32.s32 %v58_v20  ;;  %v108_v27 = vand.u32 2147483648, %v57_v19 }
  0x22   :  { %v111_v28 = vand.u32 2147483647, %v58_v20  ;;  %v116_v30 = vand.u32 2147483648, %v58_v20 }
  0x23   :  { %v106_v26 = vcvt.s32.f32 %v105_v21  ;;  %v114_v29 = vcvt.s32.f32 %v113_v24  ;;  %vm104_vm0 = vcmp.lt.f32.partialorder %v103_v23, 8388608.0 }
  0x24   :  { %vm112_vm1 = vcmp.lt.f32.partialorder %v111_v28, 8388608.0 }
  0x25   :  { %v107_v31 = vand.u32 2147483647, %v106_v26  ;;  %v115_v33 = vand.u32 2147483647, %v114_v29 }
  0x27   :  { %v109_v35 = vor.u32 %v108_v27, %v107_v31  ;;  %v117_v36 = vor.u32 %v116_v30, %v115_v33 }
  0x29   :  { %v110_v37 = vsel %vm104_vm0, %v109_v35, %v57_v19  ;;  %v118_v38 = vsel %vm112_vm1, %v117_v36, %v58_v20 }
  0x2a   :  { %v61_v39 = vmul.f32 %v110_v37, %v47_v32  ;;  %v62_v40 = vmul.f32 %v118_v38, %v48_v34 }
  0x2c   :  { %v101_v41 = vpack.c.bf16 %v62_v40, %v61_v39 }
  0x2e   :  { %102 = vst [vmem:[#allocation7] sm:$0xff] %v101_v41  }
  0x2f   :  { %156 = shalt.err (!%p153_p9)
}
  0x30   :  { %s173_s19 = smov 64   ;;  %s174_s20 = smov 4  }
  0x31   :  { %84 = dma.vmem_to_hbm [thread:$0]  %s79_s1, 128, %s201_s2, [#allocation6], %s173_s19, %s173_s19, %s174_s20  }
  0x32   :  { %167 = dma.done.wait [#allocation6], 128  }
  0x33   :  { %168 = vsyncadd [#allocation6], 4294967168 }
  0x34   :  { %88 = vsyncpa [#allocation5], 1 }
  0x35   :  { %89 = vsyncpa [#allocation6], 1 }

</bundles_post_ra>
